<compile_context>
chip_gen: v6e
topology: v6e:2x2x1
jax: 0.10.0
libtpu: 0.0.40
codegen_flags: <defaults>
</compile_context>

<pallas_src>
import functools

import jax
import jax.numpy as jnp
from jax import lax
from jax.experimental import pallas as pl
from jax.experimental.pallas import tpu as pltpu


def vq_kernel(x_ref, emb_ref, embt_ref, he2_ref, q_ref, idx_ref, sse_ref):
    """One (batch, spatial-tile) step: nearest code, quantize, partial SSE."""
    x = x_ref[0].astype(jnp.float32)          # (D, T)  channels x spatial
    e = emb_ref[...].astype(jnp.float32)      # (K, D)  codebook
    et = embt_ref[...].astype(jnp.float32)    # (D, K)  codebook^T (precomputed)
    K = e.shape[0]
    T = x.shape[1]

    # Surrogate distance: 0.5*||e_k||^2 - e_k . x_t  -- same argmin as
    # ||x||^2 + ||e_k||^2 - 2 e_k.x  (||x||^2 is constant per column).
    ex = jnp.dot(e, x, preferred_element_type=jnp.float32)       # (K, T)  MXU
    dist = he2_ref[...] - ex                                     # (K, T)

    # argmin over the codebook axis, first-occurrence tie-break (torch.argmin)
    min_d = jnp.min(dist, axis=0, keepdims=True)                 # (1, T)
    iota_k = lax.broadcasted_iota(jnp.int32, (K, T), 0)
    idx = jnp.min(jnp.where(dist <= min_d, iota_k, K), axis=0,
                  keepdims=True)                                 # (1, T) int32

    # One-hot lives only in VMEM (never written to HBM).
    enc = (iota_k == idx).astype(jnp.float32)                    # (K, T)

    # quantized^T = E^T @ onehot  -> (D, T); E^T precomputed in the wrapper.
    q = jnp.dot(et, enc, preferred_element_type=jnp.float32)     # (D, T)  MXU

    q_ref[0] = q.astype(q_ref.dtype)                             # lane-dense
    idx_ref[0] = idx                                             # lane-dense

    diff = q - x
    sse = jnp.sum(diff * diff)                                   # per-tile scalar
    sse_ref[...] = jnp.full(sse_ref.shape, sse, dtype=sse_ref.dtype)


@functools.partial(jax.jit, static_argnames=("commitment_cost", "tile_s"))
def vector_quantizer_forward(x_nchw, embedding, commitment_cost=0.25,
                             tile_s=512):
    B, C, H, W = x_nchw.shape
    K, D = embedding.shape
    assert C == D, "input channels must equal embedding_dim"
    S = H * W
    tile_s = min(tile_s, S)
    assert S % tile_s == 0, "H*W must be divisible by tile_s"
    assert tile_s % 128 == 0 or tile_s == S, "tile_s must be lane aligned"
    n_s = S // tile_s
    N = B * S

    x_f = x_nchw.astype(jnp.float32)
    x_bds = x_f.reshape(B, D, S)                  # free view, no HBM transpose

    # Grid-invariant codebook constants, computed once outside the kernel.
    emb = embedding.astype(jnp.float32)           # (K, D)
    emb_t = emb.T                                 # (D, K)
    half_e2 = 0.5 * jnp.sum(emb * emb, axis=1, keepdims=True)    # (K, 1)

    out_shapes = (
        jax.ShapeDtypeStruct((B, D, S), jnp.float32),            # quantized^T
        jax.ShapeDtypeStruct((B, 1, S), jnp.int32),              # code indices
        jax.ShapeDtypeStruct((B, n_s, 1, 128), jnp.float32),     # SSE partials
    )

    q_bds, idx, sse_part = pl.pallas_call(
        vq_kernel,
        out_shape=out_shapes,
        grid_spec=pltpu.PrefetchScalarGridSpec(
            num_scalar_prefetch=0,
            grid=(B, n_s),
            in_specs=[
                pl.BlockSpec((1, D, tile_s), lambda b, s: (b, 0, s)),  # x tile
                pl.BlockSpec((K, D), lambda b, s: (0, 0)),             # codebook
                pl.BlockSpec((D, K), lambda b, s: (0, 0)),             # codebook^T
                pl.BlockSpec((K, 1), lambda b, s: (0, 0)),             # 0.5*||e||^2
            ],
            out_specs=[
                pl.BlockSpec((1, D, tile_s), lambda b, s: (b, 0, s)),
                pl.BlockSpec((1, 1, tile_s), lambda b, s: (b, 0, s)),
                pl.BlockSpec((1, 1, 1, 128), lambda b, s: (b, s, 0, 0)),
            ],
        ),
        compiler_params=pltpu.CompilerParams(
            dimension_semantics=("parallel", "parallel"),  # no accumulators
            vmem_limit_bytes=64 * 1024 * 1024),
    )(x_bds, emb, emb_t, half_e2)

    # Losses: in the forward pass mse(q.detach(), x) == mse(q, x.detach()).
    # TODO(synk): gradients through the Pallas call need a custom VJP
    # (straight-through + codebook grads) if this is used for training.
    mse = jnp.sum(sse_part[..., 0]) / (N * D)
    e_latent_loss = mse
    q_latent_loss = mse
    loss = q_latent_loss + commitment_cost * e_latent_loss

    # Straight-through estimator; forward value matches torch's
    # inputs + (quantized - inputs).detach().
    q_nchw = q_bds.reshape(B, D, H, W)
    quantized = x_f + lax.stop_gradient(q_nchw - x_f)

    # Rebuild the (N, K) one-hot encodings (required module output) from the
    # int32 indices; rows are in (b, h, w) order, matching the reference.
    idx_flat = idx.reshape(N)
    encodings = (idx_flat[:, None] ==
                 jnp.arange(K, dtype=jnp.int32)[None, :]).astype(jnp.float32)
    avg_probs = jnp.mean(encodings, axis=0)
    perplexity = jnp.exp(-jnp.sum(avg_probs * jnp.log(avg_probs + 1e-10)))

    return loss, quantized, perplexity, encodings


if __name__ == "__main__":
    num_embeddings = 8
    embedding_dim = 4
    commitment_cost = 0.25

    key = jax.random.PRNGKey(0)
    k_emb, k_x = jax.random.split(key)

    # nn.Embedding weight ~ U(-1/K, 1/K), shape (num_embeddings, embedding_dim)
    embedding = jax.random.uniform(
        k_emb, (num_embeddings, embedding_dim),
        minval=-1.0 / num_embeddings, maxval=1.0 / num_embeddings,
        dtype=jnp.float32)

    # NCHW input, channels == embedding_dim
    x = jax.random.normal(k_x, (2, embedding_dim, 16, 16), dtype=jnp.float32)

    loss, quantized, perplexity, encodings = vector_quantizer_forward(
        x, embedding, commitment_cost=commitment_cost)
    jax.block_until_ready((loss, quantized, perplexity, encodings))

    assert quantized.shape == x.shape
    assert encodings.shape == (2 * 16 * 16, num_embeddings)
    assert loss.shape == () and perplexity.shape == ()

    print("KERNEL_OK")
</pallas_src>

<mosaic_0001>
module attributes {stable_mosaic.version = 11 : i64} {
  func.func @vq_kernel(%arg0: i32, %arg1: i32, %arg2: memref<1x4x256xf32, #tpu.memory_space<vmem>>, %arg3: memref<8x4xf32, #tpu.memory_space<vmem>>, %arg4: memref<4x8xf32, #tpu.memory_space<vmem>>, %arg5: memref<8x1xf32, #tpu.memory_space<vmem>>, %arg6: memref<1x4x256xf32, #tpu.memory_space<vmem>>, %arg7: memref<1x1x256xi32, #tpu.memory_space<vmem>>, %arg8: memref<1x1x1x128xf32, #tpu.memory_space<vmem>>) attributes {dimension_semantics = [#tpu.dimension_semantics<parallel>, #tpu.dimension_semantics<parallel>], iteration_bounds = array<i64: 2, 1>, scalar_prefetch = 0 : i64, scratch_operands = 0 : i64, tpu.core_type = #tpu.core_type<tc>, window_params = [{transform_indices = @transform_0, window_bounds = array<i64: 1, 4, 256>}, {pipeline_mode = #tpu.pipeline_mode<synchronous>, transform_indices = @transform_1, window_bounds = array<i64: 8, 4>}, {pipeline_mode = #tpu.pipeline_mode<synchronous>, transform_indices = @transform_2, window_bounds = array<i64: 4, 8>}, {pipeline_mode = #tpu.pipeline_mode<synchronous>, transform_indices = @transform_3, window_bounds = array<i64: 8, 1>}, {transform_indices = @transform_4, window_bounds = array<i64: 1, 4, 256>}, {transform_indices = @transform_5, window_bounds = array<i64: 1, 1, 256>}, {transform_indices = @transform_6, window_bounds = array<i64: 1, 1, 1, 128>}]} {
    %c0 = arith.constant 0 : index
    %c0_0 = arith.constant 0 : index
    %c0_1 = arith.constant 0 : index
    %0 = vector.load %arg2[%c0, %c0_0, %c0_1] : memref<1x4x256xf32, #tpu.memory_space<vmem>>, vector<1x4x256xf32>
    %1 = vector.shape_cast %0 : vector<1x4x256xf32> to vector<4x256xf32>
    %c0_2 = arith.constant 0 : index
    %c0_3 = arith.constant 0 : index
    %2 = vector.load %arg3[%c0_2, %c0_3] : memref<8x4xf32, #tpu.memory_space<vmem>>, vector<8x4xf32>
    %c0_4 = arith.constant 0 : index
    %c0_5 = arith.constant 0 : index
    %3 = vector.load %arg4[%c0_4, %c0_5] : memref<4x8xf32, #tpu.memory_space<vmem>>, vector<4x8xf32>
    %cst = arith.constant dense<0.000000e+00> : vector<8x256xf32>
    %4 = tpu.matmul %2, %1, %cst {dimension_numbers = #tpu.dot_dimension_numbers<[1], [0], [0], [1], [0, 0, 1, 1], [], []>} : vector<8x4xf32>, vector<4x256xf32>, vector<8x256xf32> -> vector<8x256xf32>
    %c0_6 = arith.constant 0 : index
    %c0_7 = arith.constant 0 : index
    %5 = vector.load %arg5[%c0_6, %c0_7] : memref<8x1xf32, #tpu.memory_space<vmem>>, vector<8x1xf32>
    %6 = vector.broadcast %5 : vector<8x1xf32> to vector<8x256xf32>
    %7 = arith.subf %6, %4 : vector<8x256xf32>
    %cst_8 = arith.constant dense<0x7F800000> : vector<256xf32>
    %8 = vector.multi_reduction <minimumf>, %7, %cst_8 [0] : vector<8x256xf32> to vector<256xf32>
    %9 = vector.shape_cast %8 : vector<256xf32> to vector<1x256xf32>
    %10 = tpu.iota {dimensions = array<i32: 0>} : vector<8x256xi32>
    %11 = vector.broadcast %9 : vector<1x256xf32> to vector<8x256xf32>
    %12 = arith.cmpf ole, %7, %11 : vector<8x256xf32>
    %c8_i32 = arith.constant 8 : i32
    %13 = vector.broadcast %c8_i32 : i32 to vector<8x256xi32>
    %14 = arith.select %12, %10, %13 : vector<8x256xi1>, vector<8x256xi32>
    %cst_9 = arith.constant dense<2147483647> : vector<256xi32>
    %15 = vector.multi_reduction <minsi>, %14, %cst_9 [0] : vector<8x256xi32> to vector<256xi32>
    %16 = vector.shape_cast %15 : vector<256xi32> to vector<1x256xi32>
    %17 = vector.broadcast %16 : vector<1x256xi32> to vector<8x256xi32>
    %18 = arith.cmpi eq, %10, %17 : vector<8x256xi32>
    %19 = arith.extui %18 : vector<8x256xi1> to vector<8x256xi32>
    %20 = arith.sitofp %19 : vector<8x256xi32> to vector<8x256xf32>
    %cst_10 = arith.constant dense<0.000000e+00> : vector<4x256xf32>
    %21 = tpu.matmul %3, %20, %cst_10 {dimension_numbers = #tpu.dot_dimension_numbers<[1], [0], [0], [1], [0, 0, 1, 1], [], []>} : vector<4x8xf32>, vector<8x256xf32>, vector<4x256xf32> -> vector<4x256xf32>
    %c0_11 = arith.constant 0 : index
    %c0_12 = arith.constant 0 : index
    %c0_13 = arith.constant 0 : index
    %22 = vector.load %arg6[%c0_11, %c0_12, %c0_13] : memref<1x4x256xf32, #tpu.memory_space<vmem>>, vector<1x4x256xf32>
    %23 = vector.shape_cast %22 : vector<1x4x256xf32> to vector<4x256xf32>
    %24 = vector.shape_cast %21 : vector<4x256xf32> to vector<1x4x256xf32>
    tpu.vector_store %arg6[%c0_11, %c0_12, %c0_13], %24 {strides = array<i32>} : memref<1x4x256xf32, #tpu.memory_space<vmem>>, vector<1x4x256xf32>,
    %c0_14 = arith.constant 0 : index
    %c0_15 = arith.constant 0 : index
    %c0_16 = arith.constant 0 : index
    %25 = vector.load %arg7[%c0_14, %c0_15, %c0_16] : memref<1x1x256xi32, #tpu.memory_space<vmem>>, vector<1x1x256xi32>
    %26 = vector.shape_cast %25 : vector<1x1x256xi32> to vector<1x256xi32>
    %27 = vector.shape_cast %16 : vector<1x256xi32> to vector<1x1x256xi32>
    tpu.vector_store %arg7[%c0_14, %c0_15, %c0_16], %27 {strides = array<i32>} : memref<1x1x256xi32, #tpu.memory_space<vmem>>, vector<1x1x256xi32>,
    %28 = arith.subf %21, %1 : vector<4x256xf32>
    %29 = arith.mulf %28, %28 : vector<4x256xf32>
    %30 = vector.shape_cast %29 : vector<4x256xf32> to vector<1x4x256xf32>
    %cst_17 = arith.constant dense<0.000000e+00> : vector<1xf32>
    %31 = vector.multi_reduction <add>, %30, %cst_17 [1, 2] : vector<1x4x256xf32> to vector<1xf32>
    %32 = vector.shape_cast %31 : vector<1xf32> to vector<1x1x1xf32>
    %33 = vector.extract %32[0, 0, 0] : f32 from vector<1x1x1xf32>
    %34 = vector.broadcast %33 : f32 to vector<1x1x1x128xf32>
    %c0_18 = arith.constant 0 : index
    %c0_19 = arith.constant 0 : index
    %c0_20 = arith.constant 0 : index
    %c0_21 = arith.constant 0 : index
    %35 = vector.load %arg8[%c0_18, %c0_19, %c0_20, %c0_21] : memref<1x1x1x128xf32, #tpu.memory_space<vmem>>, vector<1x1x1x128xf32>
    tpu.vector_store %arg8[%c0_18, %c0_19, %c0_20, %c0_21], %34 {strides = array<i32>} : memref<1x1x1x128xf32, #tpu.memory_space<vmem>>, vector<1x1x1x128xf32>,
    return
  }
  func.func @transform_0(%arg0: i32, %arg1: i32) -> (i32, i32, i32) {
    %c0_i32 = arith.constant 0 : i32
    %c0_i32_0 = arith.constant 0 : i32
    return %arg0, %c0_i32, %arg1 : i32, i32, i32
  }
  func.func @transform_1(%arg0: i32, %arg1: i32) -> (i32, i32) {
    %c0_i32 = arith.constant 0 : i32
    %c0_i32_0 = arith.constant 0 : i32
    %c0_i32_1 = arith.constant 0 : i32
    return %c0_i32, %c0_i32_0 : i32, i32
  }
  func.func @transform_2(%arg0: i32, %arg1: i32) -> (i32, i32) {
    %c0_i32 = arith.constant 0 : i32
    %c0_i32_0 = arith.constant 0 : i32
    %c0_i32_1 = arith.constant 0 : i32
    return %c0_i32, %c0_i32_0 : i32, i32
  }
  func.func @transform_3(%arg0: i32, %arg1: i32) -> (i32, i32) {
    %c0_i32 = arith.constant 0 : i32
    %c0_i32_0 = arith.constant 0 : i32
    %c0_i32_1 = arith.constant 0 : i32
    return %c0_i32, %c0_i32_0 : i32, i32
  }
  func.func @transform_4(%arg0: i32, %arg1: i32) -> (i32, i32, i32) {
    %c0_i32 = arith.constant 0 : i32
    %c0_i32_0 = arith.constant 0 : i32
    return %arg0, %c0_i32, %arg1 : i32, i32, i32
  }
  func.func @transform_5(%arg0: i32, %arg1: i32) -> (i32, i32, i32) {
    %c0_i32 = arith.constant 0 : i32
    %c0_i32_0 = arith.constant 0 : i32
    return %arg0, %c0_i32, %arg1 : i32, i32, i32
  }
  func.func @transform_6(%arg0: i32, %arg1: i32) -> (i32, i32, i32, i32) {
    %c0_i32 = arith.constant 0 : i32
    %c0_i32_0 = arith.constant 0 : i32
    %c0_i32_1 = arith.constant 0 : i32
    return %arg0, %arg1, %c0_i32, %c0_i32_0 : i32, i32, i32, i32
  }
}

</mosaic_0001>

<bundles_post_ra>
// kernel: vector_quantizer_forward.1
= control target key start
LH: loop header
LB: loop body
LE: loop exit
PB: predicated region body
PF: predicated region fallthrough
CT: control target
= control target key end

     0   :  { %s866_s21 = smov 0   ;;  %s868_s22 = smov 0   ;;  %s937_s0 = inlined_call_operand.vmem [shape: f32[2,4,256], index: 0, kind: input, shape index: {}]   ;;  %s938_s1 = inlined_call_operand.vmem [shape: f32[8,4], index: 1, kind: input, shape index: {}]   ;;  %s939_s2 = inlined_call_operand.vmem [shape: f32[4,8], index: 2, kind: input, shape index: {}]   ;;  %s940_s3 = inlined_call_operand.vmem [shape: f32[8,1], index: 3, kind: input, shape index: {}]   ;;  %s941_s4 = inlined_call_operand.vmem [shape: f32[2,4,256], index: 4, kind: output, shape index: {0}]   ;;  %s942_s5 = inlined_call_operand.vmem [shape: s32[2,1,256], index: 5, kind: output, shape index: {1}]   ;;  %s943_s6 = inlined_call_operand.vmem [shape: f32[2,1,1,128], index: 6, kind: output, shape index: {2}]  }
   0x1   :  { %s870_s23 = smov 0  }
   0x2 LB: > { %s29_s24 = sadd.s32 1, %s821_s22  ;;  %p753_p0 = scmp.ge.s32.totalorder %s825_s23, 1  ;;  %s825_s23 = sphi %s870_s23, %s17_s23   ;;  %s821_s22 = sphi %s868_s22, %s945_s22   ;;  %s817_s21 = sphi %s866_s21, %s944_s21  }
   0x3   : > { %p31_p1 = scmp.ge.s32.totalorder %s29_s24, 2  ;;  %p242_p2 = scmp.lt.s32.totalorder %s825_s23, 3 }
   0x5   : > { %s947_s24 = smov (%p31_p1, %s29_s24), 0  ;;  %p243_p3 = pnand %p753_p0, %p242_p2 }
   0x6   : > { %p295_p4 = scmp.lt.s32.totalorder (!%p243_p3), %s817_s21, 1 }
   0x7   : > { %246 = sbr.rel (%p243_p3) target bundleno = 650 (0x28a), region = 36 }
   0xc   : > { %v827_v0 = vmov 0.0   ;;  %v828_v1 = vmov 0   ;;  %v414_v2 = vld [vmem:[%s940_s3] sm:$0xff]  ;;  %s949_s21 = smov (!%p295_p4, %s817_s21), 1  ;;  %vm338_vm0 = vcmask 1043456   ;;  %vm334_vm1 = vcmask 31744  }
   0xd   : > { %407 = vmatprep.mubr.f32.mxu0 %v827_v0  ;;  %801 = vset.pattern.permute.xlu0 %v828_v1  ;;  %s769_s27 = sshll.u32 %s949_s21, 3  ;;  %v330_v5 = vld [vmem:[%s938_s1] sm:$0xff]  ;;  %v434_v16 = vlaneseq  ;;  %v829_v31 = vmov 1966171168   ;;  %s758_s9 = sshll.u32 %s949_s21, 1  ;;  %vm464_vm11 = vcmask 64512  }
   0xe   : > { %417 = vperm.xlu0 %801, %v414_v2   ;;  %532 = vmatprep.mubr.f32.mxu1 %v827_v0  ;;  %s302_s30 = scalar_lea.vmem %s937_s0, %s769_s27  ;;  %v546_v32 = vunpack.c.l.s4 %v829_v31  ;;  %v331_v44 = vld [vmem:[%s939_s2] sm:$0xf]  ;;  %v830_v45 = vmov 1.0   ;;  %s321_s14 = scalar_lea.vmem %s942_s5, %s758_s9 }
   0xf   : > { %v895_v3 = vld [vmem:[%s302_s30] sm:$0xff]  ;;  %v435_v21 = vshrl.u32 %v434_v16, 7  ;;  %vm561_vm13 = vcmp.lt.s32.totalorder %v434_v16, 256  ;;  %s312_s17 = scalar_lea.vmem %s941_s4, %s769_s27  ;;  %s328_s20 = scalar_lea.vmem %s943_s6, %s949_s21 }
  0x10   : > { %v899_v4 = vcombine.high %v895_v3, %v895_v3  ;;  %v547_v37 = vunpack.c.0.s8 %v546_v32 }
  0x12   : > { %759 = vmatprep.subr.msk.mxu0 %vm338_vm0, %v899_v4  ;;  %v550_v41 = vsub.s32 %v547_v37, %v435_v21 }
  0x13   : > { %760 = vmatpush1.msk.msra.mxu0 %vm338_vm0, %v895_v3 }
  0x14   : > { %761 = vmatmul.mubr.msk.f32.vlgmr.msra.gmra.mxu0 %vm334_vm1, %v330_v5 }
  0x89   : > { %v418_v6 = vpop.permute.xlu0 %417 }
  0xd4   : > { %v409_v7 = vpop.f32.mrf.mxu0 }
  0xd5   : > { %v420_v8 = vsub.f32 %v418_v6, %v409_v7 }
  0xd6   : > { %v411_v9 = vpop.f32.mrf.mxu0 }
  0xd7   : > { %v422_v10 = vrot.slane %v420_v8, 4  ;;  %v421_v11 = vsub.f32 %v418_v6, %v411_v9 }
  0xd9   : > { %v423_v12 = vmin.f32 %v420_v8, %v422_v10  ;;  %v428_v13 = vrot.slane %v421_v11, 4 }
  0xdb   : > { %v424_v14 = vrot.slane %v423_v12, 2  ;;  %v429_v15 = vmin.f32 %v421_v11, %v428_v13 }
  0xdd   : > { %v425_v17 = vmin.f32 %v423_v12, %v424_v14  ;;  %v430_v18 = vrot.slane %v429_v15, 2 }
  0xdf   : > { %v426_v19 = vrot.slane %v425_v17, 1  ;;  %v431_v20 = vmin.f32 %v429_v15, %v430_v18 }
  0xe1   : > { %v427_v22 = vmin.f32 %v425_v17, %v426_v19  ;;  %v432_v23 = vrot.slane %v431_v20, 1 }
  0xe3   : > { %vm436_vm2 = vcmp.le.f32.partialorder %v420_v8, %v427_v22  ;;  %v433_v24 = vmin.f32 %v431_v20, %v432_v23 }
  0xe4   : > { %v438_v25 = vsel %vm436_vm2, %v435_v21, 8 }
  0xe5   : > { %v440_v26 = vrot.slane %v438_v25, 4  ;;  %vm437_vm3 = vcmp.le.f32.partialorder %v421_v11, %v433_v24 }
  0xe6   : > { %v439_v27 = vsel %vm437_vm3, %v435_v21, 8 }
  0xe7   : > { %vm441_vm4 = vcmp.lt.s32.totalorder %v438_v25, %v440_v26  ;;  %v449_v28 = vrot.slane %v439_v27, 4 }
  0xe8   : > { %v442_v29 = vsel %vm441_vm4, %v438_v25, %v440_v26 }
  0xe9   : > { %v443_v30 = vrot.slane %v442_v29, 2  ;;  %vm450_vm5 = vcmp.lt.s32.totalorder %v439_v27, %v449_v28 }
  0xea   : > { %v451_v33 = vsel %vm450_vm5, %v439_v27, %v449_v28 }
  0xeb   : > { %vm444_vm6 = vcmp.lt.s32.totalorder %v442_v29, %v443_v30  ;;  %v452_v34 = vrot.slane %v451_v33, 2 }
  0xec   : > { %v445_v35 = vsel %vm444_vm6, %v442_v29, %v443_v30 }
  0xed   : > { %v446_v36 = vrot.slane %v445_v35, 1  ;;  %vm453_vm7 = vcmp.lt.s32.totalorder %v451_v33, %v452_v34 }
  0xee   : > { %v454_v38 = vsel %vm453_vm7, %v451_v33, %v452_v34 }
  0xef   : > { %vm447_vm8 = vcmp.lt.s32.totalorder %v445_v35, %v446_v36  ;;  %v455_v39 = vrot.slane %v454_v38, 1 }
  0xf0   : > { %v448_v40 = vsel %vm447_vm8, %v445_v35, %v446_v36 }
  0xf1   : > { %vm456_vm9 = vcmp.lt.s32.totalorder %v454_v38, %v455_v39  ;;  %vm458_vm12 = vcmp.eq.s32.totalorder %v435_v21, %v448_v40 }
  0xf2   : > { %v457_v42 = vsel %vm456_vm9, %v454_v38, %v455_v39 }
  0xf3   : > { %vm459_vm10 = vcmp.eq.s32.totalorder %v435_v21, %v457_v42  ;;  %v544_v43 = vcombine.low %v448_v40, %v457_v42 }
  0xf4   : > { %764 = vmatprep.subr.msk.mxu1 %vm459_vm10, %v830_v45 }
  0xf5   : > { %v551_v46 = vrot.slane %v544_v43, %v550_v41  ;;  %765 = vmatpush1.msk.msra.mxu1 %vm458_vm12, %v830_v45 }
  0xf6   : > { %766 = vmatmul.mubr.msk.f32.vlgmr.msra.gmra.mxu1 %vm464_vm11, %v331_v44 }
  0xf7   : > { %v558_v47 = vrot.slane %v551_v46, %v550_v41 }
  0xf9   : > { %563 = vst.msk [vmem:[%s321_s14] sm:$0x3] %vm561_vm13, %v558_v47 }
 0x1b6   : > { %v534_v48 = vpop.f32.mrf.mxu1 }
 0x1b7   : > { %v565_v49 = vsub.f32 %v534_v48, %v895_v3 }
 0x1b8   : > { %v536_v50 = vpop.f32.mrf.mxu1 }
 0x1b9   : > { %v567_v51 = vmul.f32 %v565_v49, %v565_v49  ;;  %v541_v52 = vcombine.low %v534_v48, %v536_v50  ;;  %v566_v53 = vsub.f32 %v536_v50, %v899_v4 }
 0x1bb   : > { %543 = vst [vmem:[%s312_s17] sm:$0xff] %v541_v52  ;;  %v568_v54 = vmul.f32 %v566_v53, %v566_v53  ;;  %v569_v55 = vsel %vm338_vm0, %v567_v51, 0.0 }
 0x1bd   : > { %v570_v56 = vsel %vm338_vm0, %v568_v54, 0.0 }
 0x1be   : > { %v571_v57 = vadd.f32 %v570_v56, %v569_v55 }
 0x1c0   : > { %572 = vadd.xlane.f32.xlu0 %v571_v57 }
 0x249   : > { %v573_v58 = vpop.xlane.xlu0 %572 }
 0x24a   : > { %v574_v59 = vrot.slane %v573_v58, 4 }
 0x24c   : > { %v575_v60 = vadd.f32 %v574_v59, %v573_v58 }
 0x24e   : > { %v576_v61 = vrot.slane %v575_v60, 2 }
 0x250   : > { %v577_v62 = vadd.f32 %v576_v61, %v575_v60 }
 0x252   : > { %v578_v63 = vrot.slane %v577_v62, 1 }
 0x254   : > { %v579_v0 = vadd.f32 %v578_v63, %v577_v62 }
 0x256   : > { %771 = vpush %v579_v0 }
 0x287   : > { %s772_s25 = spop %771 }
 0x288   : > { %v581_v1 = vstv %s772_s25 }
 0x289   : > { %582 = vst [vmem:[%s328_s20] sm:$0x1] %v581_v1 }
 0x28a PF: > { %s17_s23 = sadd.s32 1, %s825_s23   ;;  %s944_s21 = smov %s821_s22 }
 0x28b   : > { %p14_p5 = scmp.ge.s32.totalorder %s17_s23, 4   ;;  %s945_s22 = smov %s947_s24 }
 0x28d   :  { %16 = sbr.rel (!%p14_p5) target bundleno = 2 (0x2), region = 90 }

</bundles_post_ra>
